<compile_context>
chip_gen: v6e
topology: v6e:2x2x1
jax: 0.10.0
libtpu: 0.0.40
codegen_flags: <defaults>
</compile_context>

<pallas_src>
import math

import jax
import jax.numpy as jnp
from jax.experimental import pallas as pl
from jax.experimental.pallas import tpu as pltpu

LN_EPS = 1e-5


# ----------------------------- kernels -------------------------------------
def _proj_kernel(s_ref, g_ref, beta_ref, w_ref, b_ref, ab_out_ref):
    """LayerNorm(c_s) + fused (linear_1 | linear_2) projection for a tile of rows."""
    x = s_ref[...].astype(jnp.float32)                        # (tR, c_s)
    mu = jnp.mean(x, axis=-1, keepdims=True)
    var = jnp.mean(jnp.square(x - mu), axis=-1, keepdims=True)
    xn = (x - mu) * jax.lax.rsqrt(var + LN_EPS)
    xn = xn * g_ref[...] + beta_ref[...]                      # (1, c_s) broadcasts
    xh = xn.astype(w_ref.dtype)                               # bf16 MXU operands
    ab = jnp.dot(xh, w_ref[...], preferred_element_type=jnp.float32) + b_ref[...]
    ab_out_ref[...] = ab.astype(ab_out_ref.dtype)             # (tR, 2*c_hidden), lane-dense


def _opm_kernel(a_ref, t_ref, bias_ref, o_ref):
    """Hot path: one MXU matmul per (i, j) tile, lane-dense (tI, tJ*c_z) store."""
    out = jnp.dot(a_ref[0], t_ref[0],                         # (tI,h) @ (h, tJ*c_z)
                  preferred_element_type=jnp.float32)
    o_ref[0] = (out + bias_ref[...]).astype(o_ref.dtype)      # (1, tJ*c_z) broadcasts


# ----------------------------- helpers --------------------------------------
def _pick_tile(n, target, quantum=8):
    """Largest divisor of n that is <= target and a multiple of `quantum`.
    Falls back to the full extent n (always a legal block) if none exists."""
    t = min(target, n)
    if t >= n:
        return n
    start = t - (t % quantum)
    for cand in range(start, 0, -quantum):
        if n % cand == 0:
            return cand
    return n


def _vmem_capacity_bytes():
    """Per-core VMEM capacity; conservative 64 MiB (v7x) fallback."""
    try:
        info = pltpu.get_tpu_info()
        cap = getattr(info, "vmem_capacity_bytes", None)
        if cap:
            return int(cap)
    except Exception:
        pass
    return 64 * 1024 * 1024


def _stage2_vmem_bytes(t_i, t_j, c_hidden, c_z, out_bytes, cd_bytes=2):
    """Double-buffered VMEM footprint of the stage-2 blocks."""
    a_b = t_i * c_hidden * cd_bytes
    t_b = c_hidden * t_j * c_z * cd_bytes
    bias_b = t_j * c_z * 4
    out_b = t_i * t_j * c_z * out_bytes
    return 2 * (a_b + t_b + bias_b + out_b)


# ----------------------------- wrapper --------------------------------------
def outer_product_mean_ss(s, params, *, tile_rows=1024,
                          compute_dtype=jnp.bfloat16, out_dtype=jnp.bfloat16):
    """Forward pass of OuterProductMeanSS.  Output dtype defaults to bf16
    (dominant HBM stream); pass out_dtype=jnp.float32 for a full-precision store."""
    N, L, c_s = s.shape
    p = params
    c_hidden = p["w1"].shape[1]
    c_z = p["w_out"].shape[1]
    out_bytes = jnp.dtype(out_dtype).itemsize
    vmem_cap = _vmem_capacity_bytes()

    # ---------------- stage 1: LayerNorm + fused hidden projections ---------
    R = N * L
    t_r = _pick_tile(R, tile_rows, quantum=16)                # bf16 output -> quantum 16
    assert R % t_r == 0
    s2 = s.reshape(R, c_s)
    w_cat = jnp.concatenate([p["w1"], p["w2"]], axis=1).astype(compute_dtype)
    b_cat = jnp.concatenate([p["b1"], p["b2"]]).reshape(1, -1).astype(jnp.float32)

    ab = pl.pallas_call(
        _proj_kernel,
        out_shape=jax.ShapeDtypeStruct((R, 2 * c_hidden), compute_dtype),
        grid_spec=pltpu.PrefetchScalarGridSpec(
            num_scalar_prefetch=0,
            grid=(R // t_r,),
            in_specs=[
                pl.BlockSpec((t_r, c_s), lambda r: (r, 0)),
                pl.BlockSpec((1, c_s), lambda r: (0, 0)),
                pl.BlockSpec((1, c_s), lambda r: (0, 0)),
                pl.BlockSpec((c_s, 2 * c_hidden), lambda r: (0, 0)),
                pl.BlockSpec((1, 2 * c_hidden), lambda r: (0, 0)),
            ],
            out_specs=pl.BlockSpec((t_r, 2 * c_hidden), lambda r: (r, 0)),
        ),
        compiler_params=pltpu.CompilerParams(
            dimension_semantics=("parallel",)),
    )(s2, p["ln_gamma"].reshape(1, -1), p["ln_beta"].reshape(1, -1), w_cat, b_cat)

    a_fea = ab[:, :c_hidden].reshape(N, L, c_hidden)
    b_fea = ab[:, c_hidden:].reshape(N, L, c_hidden)

    # -------- wrapper-side factorization (tiny: O(N*L*h^2*c_z) flops) -------
    # T[n, p, j*c_z + z] = sum_q b[n, j, q] * W[p, q, z]
    # bf16 operands + f32 accumulation (result is rounded to bf16 right after).
    w3 = p["w_out"].reshape(c_hidden, c_hidden, c_z).astype(compute_dtype)  # [p, q, z]
    t_all = jnp.einsum("nlq,pqz->nplz", b_fea, w3,
                       preferred_element_type=jnp.float32)
    t_all = t_all.reshape(N, c_hidden, L * c_z).astype(compute_dtype)
    bias_tiled = jnp.tile(p["b_out"].astype(jnp.float32), (L,)).reshape(1, L * c_z)

    # ---------------- stage 2: per-(i,j)-tile MXU matmul (hot path) ----------
    # j tile: make t_j*c_z a multiple of 128 (unmasked lane-dense stores).
    qj = 128 // math.gcd(c_z, 128)
    t_j = _pick_tile(L, max(128, qj), quantum=qj)
    assert (t_j * c_z) % 128 == 0 or t_j == L

    # i tile: try 256 first (halves grid steps), fall back to smaller if the
    # double-buffered footprint would exceed ~half of this generation's VMEM.
    q_i = 16 if out_bytes == 2 else 8
    budget = max(int(vmem_cap * 0.5), 24 << 20)
    t_i = None
    for target_i in (256, 128, 64):
        cand = _pick_tile(L, target_i, quantum=q_i)
        if _stage2_vmem_bytes(cand, t_j, c_hidden, c_z, out_bytes) + (2 << 20) <= budget:
            t_i = cand
            break
    if t_i is None:
        t_i = _pick_tile(L, 64, quantum=q_i)
    assert L % t_i == 0 and L % t_j == 0
    assert (t_i % 8 == 0) or (t_i == L)

    need = _stage2_vmem_bytes(t_i, t_j, c_hidden, c_z, out_bytes)
    vmem_limit = need + (8 << 20)
    vmem_limit = max(vmem_limit, 32 << 20)
    vmem_limit = min(vmem_limit, int(vmem_cap * 0.6))
    vmem_limit = max(vmem_limit, need + (4 << 20))          # never below actual need

    nj, ni = L // t_j, L // t_i
    # Megacore load balance (v7x): if N is odd/1, put the larger j axis outermost.
    # T-block reuse across the inner i axis is preserved in both orderings.
    j_outer = (N % 2 != 0) and (nj > N)
    if j_outer:
        grid = (nj, N, ni)
        a_map = lambda j, n, i: (n, i, 0)
        t_map = lambda j, n, i: (n, 0, j)
        bias_map = lambda j, n, i: (0, j)
        o_map = lambda j, n, i: (n, i, j)
    else:
        grid = (N, nj, ni)
        a_map = lambda n, j, i: (n, i, 0)
        t_map = lambda n, j, i: (n, 0, j)
        bias_map = lambda n, j, i: (0, j)
        o_map = lambda n, j, i: (n, i, j)

    z2d = pl.pallas_call(
        _opm_kernel,
        out_shape=jax.ShapeDtypeStruct((N, L, L * c_z), out_dtype),
        grid_spec=pltpu.PrefetchScalarGridSpec(
            num_scalar_prefetch=0,
            grid=grid,
            in_specs=[
                pl.BlockSpec((1, t_i, c_hidden), a_map),
                pl.BlockSpec((1, c_hidden, t_j * c_z), t_map),
                pl.BlockSpec((1, t_j * c_z), bias_map),
            ],
            out_specs=pl.BlockSpec((1, t_i, t_j * c_z), o_map),
        ),
        compiler_params=pltpu.CompilerParams(
            dimension_semantics=("parallel", "parallel", "parallel"),
            vmem_limit_bytes=int(vmem_limit)),
    )(a_fea, t_all, bias_tiled)

    return z2d.reshape(N, L, L, c_z)


# ----------------------------- params / reference ---------------------------
def init_params(key, c_s, c_z, c_hidden):
    ks = jax.random.split(key, 6)
    s_in = 1.0 / jnp.sqrt(jnp.float32(c_s))
    s_hh = 1.0 / jnp.sqrt(jnp.float32(c_hidden * c_hidden))
    # NOTE: the reference module uses init='final' (zero init) for linear_out; we use
    # small random weights so the test exercises the full compute path.
    return dict(
        ln_gamma=jnp.ones((c_s,), jnp.float32),
        ln_beta=jnp.zeros((c_s,), jnp.float32),
        w1=jax.random.normal(ks[0], (c_s, c_hidden), jnp.float32) * s_in,
        b1=jax.random.normal(ks[1], (c_hidden,), jnp.float32) * 0.1,
        w2=jax.random.normal(ks[2], (c_s, c_hidden), jnp.float32) * s_in,
        b2=jax.random.normal(ks[3], (c_hidden,), jnp.float32) * 0.1,
        w_out=jax.random.normal(ks[4], (c_hidden * c_hidden, c_z), jnp.float32) * s_hh,
        b_out=jax.random.normal(ks[5], (c_z,), jnp.float32) * 0.1,
    )


def reference(s, p):
    """Pure-f32 reference of the PyTorch forward (local precision='highest')."""
    x = s.astype(jnp.float32)
    mu = jnp.mean(x, axis=-1, keepdims=True)
    var = jnp.mean((x - mu) ** 2, axis=-1, keepdims=True)
    xn = (x - mu) / jnp.sqrt(var + LN_EPS)
    xn = xn * p["ln_gamma"] + p["ln_beta"]
    a = jnp.dot(xn, p["w1"], precision="highest") + p["b1"]
    b = jnp.dot(xn, p["w2"], precision="highest") + p["b2"]
    N, L, h = a.shape
    o = (a[:, :, None, :, None] * b[:, None, :, None, :]).reshape(N, L, L, h * h)
    return jnp.dot(o, p["w_out"], precision="highest") + p["b_out"]


# ----------------------------- main ------------------------------------------
if __name__ == "__main__":
    N, L, c_s, c_hidden, c_z = 2, 32, 64, 32, 32
    key = jax.random.PRNGKey(0)
    k_s, k_p = jax.random.split(key)
    s = jax.random.normal(k_s, (N, L, c_s), jnp.float32)
    params = init_params(k_p, c_s, c_z, c_hidden)

    z = outer_product_mean_ss(s, params)            # bf16 output (default)
    z = jax.block_until_ready(z)
    z_ref = reference(s, params)
    assert z.shape == (N, L, L, c_z)

    # Kernel uses bf16 MXU operands / bf16 T / bf16 output store (f32 accumulation),
    # per the perf review, so compare against the pure-f32 reference with a
    # bf16-appropriate tolerance.
    zf = z.astype(jnp.float32)
    max_err = float(jnp.max(jnp.abs(zf - z_ref)))
    rel_fro = float(jnp.linalg.norm(zf - z_ref) / (jnp.linalg.norm(z_ref) + 1e-12))
    assert jnp.allclose(zf, z_ref, atol=6e-2, rtol=6e-2), (max_err, rel_fro)
    assert rel_fro < 2e-2, (max_err, rel_fro)

    # f32-output regression path (same kernel, full-precision final store).
    z32 = jax.block_until_ready(outer_product_mean_ss(s, params, out_dtype=jnp.float32))
    rel_fro32 = float(jnp.linalg.norm(z32 - z_ref) / (jnp.linalg.norm(z_ref) + 1e-12))
    assert rel_fro32 < 2e-2, rel_fro32

    print("KERNEL_OK")
</pallas_src>

<mosaic_0001>
module attributes {stable_mosaic.version = 11 : i64} {
  func.func @_proj_kernel(%arg0: i32, %arg1: memref<64x64xf32, #tpu.memory_space<vmem>>, %arg2: memref<1x64xf32, #tpu.memory_space<vmem>>, %arg3: memref<1x64xf32, #tpu.memory_space<vmem>>, %arg4: memref<64x64xbf16, #tpu.memory_space<vmem>>, %arg5: memref<1x64xf32, #tpu.memory_space<vmem>>, %arg6: memref<64x64xbf16, #tpu.memory_space<vmem>>) attributes {dimension_semantics = [#tpu.dimension_semantics<parallel>], iteration_bounds = array<i64: 1>, scalar_prefetch = 0 : i64, scratch_operands = 0 : i64, tpu.core_type = #tpu.core_type<tc>, window_params = [{transform_indices = @transform_0, window_bounds = array<i64: 64, 64>}, {pipeline_mode = #tpu.pipeline_mode<synchronous>, transform_indices = @transform_1, window_bounds = array<i64: 1, 64>}, {pipeline_mode = #tpu.pipeline_mode<synchronous>, transform_indices = @transform_2, window_bounds = array<i64: 1, 64>}, {pipeline_mode = #tpu.pipeline_mode<synchronous>, transform_indices = @transform_3, window_bounds = array<i64: 64, 64>}, {pipeline_mode = #tpu.pipeline_mode<synchronous>, transform_indices = @transform_4, window_bounds = array<i64: 1, 64>}, {transform_indices = @transform_5, window_bounds = array<i64: 64, 64>}]} {
    %c0 = arith.constant 0 : index
    %c0_0 = arith.constant 0 : index
    %0 = vector.load %arg1[%c0, %c0_0] : memref<64x64xf32, #tpu.memory_space<vmem>>, vector<64x64xf32>
    %cst = arith.constant dense<0.000000e+00> : vector<64xf32>
    %1 = vector.multi_reduction <add>, %0, %cst [1] : vector<64x64xf32> to vector<64xf32>
    %2 = vector.shape_cast %1 : vector<64xf32> to vector<64x1xf32>
    %cst_1 = arith.constant 6.400000e+01 : f32
    %3 = vector.broadcast %cst_1 : f32 to vector<64x1xf32>
    %4 = arith.divf %2, %3 : vector<64x1xf32>
    %5 = vector.broadcast %4 : vector<64x1xf32> to vector<64x64xf32>
    %6 = arith.subf %0, %5 : vector<64x64xf32>
    %7 = arith.mulf %6, %6 : vector<64x64xf32>
    %cst_2 = arith.constant dense<0.000000e+00> : vector<64xf32>
    %8 = vector.multi_reduction <add>, %7, %cst_2 [1] : vector<64x64xf32> to vector<64xf32>
    %9 = vector.shape_cast %8 : vector<64xf32> to vector<64x1xf32>
    %cst_3 = arith.constant 6.400000e+01 : f32
    %10 = vector.broadcast %cst_3 : f32 to vector<64x1xf32>
    %11 = arith.divf %9, %10 : vector<64x1xf32>
    %12 = vector.broadcast %4 : vector<64x1xf32> to vector<64x64xf32>
    %13 = arith.subf %0, %12 : vector<64x64xf32>
    %cst_4 = arith.constant 9.99999974E-6 : f32
    %14 = vector.broadcast %cst_4 : f32 to vector<64x1xf32>
    %15 = arith.addf %11, %14 : vector<64x1xf32>
    %16 = math.rsqrt %15 : vector<64x1xf32>
    %17 = vector.broadcast %16 : vector<64x1xf32> to vector<64x64xf32>
    %18 = arith.mulf %13, %17 : vector<64x64xf32>
    %c0_5 = arith.constant 0 : index
    %c0_6 = arith.constant 0 : index
    %19 = vector.load %arg2[%c0_5, %c0_6] : memref<1x64xf32, #tpu.memory_space<vmem>>, vector<1x64xf32>
    %20 = vector.broadcast %19 : vector<1x64xf32> to vector<64x64xf32>
    %21 = arith.mulf %18, %20 : vector<64x64xf32>
    %c0_7 = arith.constant 0 : index
    %c0_8 = arith.constant 0 : index
    %22 = vector.load %arg3[%c0_7, %c0_8] : memref<1x64xf32, #tpu.memory_space<vmem>>, vector<1x64xf32>
    %23 = vector.broadcast %22 : vector<1x64xf32> to vector<64x64xf32>
    %24 = arith.addf %21, %23 : vector<64x64xf32>
    %25 = arith.truncf %24 : vector<64x64xf32> to vector<64x64xbf16>
    %c0_9 = arith.constant 0 : index
    %c0_10 = arith.constant 0 : index
    %26 = vector.load %arg4[%c0_9, %c0_10] : memref<64x64xbf16, #tpu.memory_space<vmem>>, vector<64x64xbf16>
    %cst_11 = arith.constant dense<0.000000e+00> : vector<64x64xf32>
    %27 = tpu.matmul %25, %26, %cst_11 {dimension_numbers = #tpu.dot_dimension_numbers<[1], [0], [0], [1], [0, 0, 1, 1], [], []>} : vector<64x64xbf16>, vector<64x64xbf16>, vector<64x64xf32> -> vector<64x64xf32>
    %c0_12 = arith.constant 0 : index
    %c0_13 = arith.constant 0 : index
    %28 = vector.load %arg5[%c0_12, %c0_13] : memref<1x64xf32, #tpu.memory_space<vmem>>, vector<1x64xf32>
    %29 = vector.broadcast %28 : vector<1x64xf32> to vector<64x64xf32>
    %30 = arith.addf %27, %29 : vector<64x64xf32>
    %31 = arith.truncf %30 : vector<64x64xf32> to vector<64x64xbf16>
    %c0_14 = arith.constant 0 : index
    %c0_15 = arith.constant 0 : index
    %32 = vector.load %arg6[%c0_14, %c0_15] : memref<64x64xbf16, #tpu.memory_space<vmem>>, vector<64x64xbf16>
    tpu.vector_store %arg6[%c0_14, %c0_15], %31 {strides = array<i32>} : memref<64x64xbf16, #tpu.memory_space<vmem>>, vector<64x64xbf16>,
    return
  }
  func.func @transform_0(%arg0: i32) -> (i32, i32) {
    %c0_i32 = arith.constant 0 : i32
    %c0_i32_0 = arith.constant 0 : i32
    return %arg0, %c0_i32 : i32, i32
  }
  func.func @transform_1(%arg0: i32) -> (i32, i32) {
    %c0_i32 = arith.constant 0 : i32
    %c0_i32_0 = arith.constant 0 : i32
    %c0_i32_1 = arith.constant 0 : i32
    return %c0_i32, %c0_i32_0 : i32, i32
  }
  func.func @transform_2(%arg0: i32) -> (i32, i32) {
    %c0_i32 = arith.constant 0 : i32
    %c0_i32_0 = arith.constant 0 : i32
    %c0_i32_1 = arith.constant 0 : i32
    return %c0_i32, %c0_i32_0 : i32, i32
  }
  func.func @transform_3(%arg0: i32) -> (i32, i32) {
    %c0_i32 = arith.constant 0 : i32
    %c0_i32_0 = arith.constant 0 : i32
    %c0_i32_1 = arith.constant 0 : i32
    return %c0_i32, %c0_i32_0 : i32, i32
  }
  func.func @transform_4(%arg0: i32) -> (i32, i32) {
    %c0_i32 = arith.constant 0 : i32
    %c0_i32_0 = arith.constant 0 : i32
    %c0_i32_1 = arith.constant 0 : i32
    return %c0_i32, %c0_i32_0 : i32, i32
  }
  func.func @transform_5(%arg0: i32) -> (i32, i32) {
    %c0_i32 = arith.constant 0 : i32
    %c0_i32_0 = arith.constant 0 : i32
    return %arg0, %c0_i32 : i32, i32
  }
}

</mosaic_0001>

<bundles_post_ra>
// kernel: tpu_custom_call.1
= control target key start
LH: loop header
LB: loop body
LE: loop exit
PB: predicated region body
PF: predicated region fallthrough
CT: control target
= control target key end

     0   :  { %10 = vsyncpa [#allocation3], 0  ;;  %s654_s0 = inlined_call_operand.hbm [shape: f32[64,64], index: 0, kind: input, shape index: {}]   ;;  %s655_s1 = inlined_call_operand.vmem [shape: f32[1,64], index: 1, kind: input, shape index: {}]   ;;  %s656_s2 = inlined_call_operand.vmem [shape: f32[1,64], index: 2, kind: input, shape index: {}]   ;;  %s657_s3 = inlined_call_operand.hbm [shape: bf16[64,64], index: 3, kind: input, shape index: {}]   ;;  %s658_s4 = inlined_call_operand.vmem [shape: f32[1,64], index: 4, kind: input, shape index: {}]   ;;  %s659_s5 = inlined_call_operand.hbm [shape: bf16[64,64], index: 5, kind: output, shape index: {}]  }
   0x1   :  { %11 = vsyncpa [#allocation6], 0 }
   0x2   :  { %12 = vsyncpa [#allocation4], 0  ;;  %s525_s18 = smov [#allocation2]  }
   0x3   :  { %s18_s19 = sshll.u32 %s525_s18, 4  ;;  %s19_s19 = int_to_ptr.vmem [resolvable:$true] %s18_s19 }
   0x4   :  { %s467_s20 = scalar_lea.vmem %s19_s19, 1024  ;;  %p472_p1 = scmp.lt.s32.totalorder %s19_s19, %s19_s19 }
   0x5   :  { %p468_p0 = scmp.ne.s32.totalorder %s19_s19, %s467_s20  ;;  %p473_p2 = scmp.lt.s32.totalorder %s467_s20, %s467_s20 }
   0x7   :  { %p474_p3 = por %p473_p2, %p472_p1 }
   0x9   :  { %p475_p4 = pnand %p474_p3, %p468_p0 }
   0xb   :  { %478 = shalt.err (!%p475_p4)
}
   0xc   :  { %s526_s21 = smov 128   ;;  %s527_s22 = smov 8  }
   0xd   :  { %24 = dma.hbm_to_vmem [thread:$0]  %s654_s0, 1024, %s19_s19, [#allocation3], %s526_s21, %s526_s21, %s527_s22  }
   0xe   :  { %s528_s25 = smov [#allocation5]  }
   0xf   :  { %s34_s26 = sshll.u32 %s528_s25, 4  ;;  %s35_s26 = int_to_ptr.vmem [resolvable:$true] %s34_s26 }
  0x10   :  { %s487_s27 = scalar_lea.vmem %s35_s26, 512  ;;  %p492_p6 = scmp.lt.s32.totalorder %s35_s26, %s35_s26 }
  0x11   :  { %p488_p5 = scmp.ne.s32.totalorder %s35_s26, %s487_s27  ;;  %p493_p7 = scmp.lt.s32.totalorder %s487_s27, %s487_s27 }
  0x13   :  { %p494_p8 = por %p493_p7, %p492_p6 }
  0x15   :  { %p495_p9 = pnand %p494_p8, %p488_p5 }
  0x17   :  { %498 = shalt.err (!%p495_p9)
}
  0x18   :  { %s529_s28 = smov 64   ;;  %s530_s29 = smov 4  }
  0x19   :  { %40 = dma.hbm_to_vmem [thread:$0]  %s657_s3, 512, %s35_s26, [#allocation6], %s529_s28, %s529_s28, %s530_s29  }
  0x1a   :  { %519 = dma.done.wait [#allocation3], 1024  }
  0x1b   :  { %520 = vsyncadd [#allocation3], 4294966272 }
  0x1c   :  { %521 = dma.done.wait [#allocation6], 512  }
  0x1d   :  { %522 = vsyncadd [#allocation6], 4294966784  ;;  %vm58_vm0 = vcmask 523264   ;;  %v50_v0 = vld [vmem:[#allocation2] sm:$0xff]  ;;  %v51_v2 = vld [vmem:[#allocation2 + $0x8] sm:$0xff]  ;;  %vm346_vm1 = vcmask 519168  }
  0x1e   :  { %v54_v1 = vld [vmem:[#allocation2 + $0x20] sm:$0xff]  ;;  %v59_v3 = vsel %vm58_vm0, %v50_v0, 0.0  ;;  %v55_v5 = vld [vmem:[#allocation2 + $0x28] sm:$0xff]  ;;  %v62_v6 = vsel %vm58_vm0, %v51_v2, 0.0  ;;  %v52_v7 = vld [vmem:[#allocation2 + $0x10] sm:$0xff] }
  0x1f   :  { %v71_v4 = vsel %vm58_vm0, %v54_v1, 0.0  ;;  %60 = vadd.xlane.f32.xlu0 %v59_v3  ;;  %v74_v8 = vsel %vm58_vm0, %v55_v5, 0.0  ;;  %v53_v9 = vld [vmem:[#allocation2 + $0x18] sm:$0xff]  ;;  %v65_v10 = vsel %vm58_vm0, %v52_v7, 0.0  ;;  %v56_v12 = vld [vmem:[#allocation2 + $0x30] sm:$0xff]  ;;  %v441_v58 = vld [vmem:[#allocation5 + $0x8] sm:$0xff]  }
  0x20   :  { %72 = vadd.xlane.f32.xlu1 %v71_v4  ;;  %v68_v11 = vsel %vm58_vm0, %v53_v9, 0.0  ;;  %v57_v13 = vld [vmem:[#allocation2 + $0x38] sm:$0xff]  ;;  %v77_v14 = vsel %vm58_vm0, %v56_v12, 0.0  ;;  %v440_v57 = vld [vmem:[#allocation5 + $0x10] sm:$0xff]   ;;  %v442_v59 = vld [vmem:[#allocation5] sm:$0xff]  }
  0x21   :  { %v80_v15 = vsel %vm58_vm0, %v57_v13, 0.0  ;;  %v439_v56 = vld [vmem:[#allocation5 + $0x18] sm:$0xff]  }
  0x22   :  { %408 = vmatprep.subr.bf16.mxu0 %v439_v56  ;;  %424 = vmatprep.subr.bf16.mxu1 %v439_v56 }
  0x23   :  { %63 = vadd.xlane.f32.xlu0 %v62_v6  ;;  %409 = vmatpush3.bf16.msra.mxu0 %v439_v56 }
  0x24   :  { %75 = vadd.xlane.f32.xlu1 %v74_v8  ;;  %428 = vmatpush3.bf16.msra.mxu1 %v439_v56 }
  0x25   :  { %410 = vmatprep.subr.bf16.mxu0 %v440_v57  ;;  %425 = vmatprep.subr.bf16.mxu1 %v440_v57 }
  0x27   :  { %66 = vadd.xlane.f32.xlu0 %v65_v10  ;;  %411 = vmatpush3.bf16.msra.mxu0 %v440_v57 }
  0x28   :  { %69 = vadd.xlane.f32.xlu1 %v68_v11  ;;  %429 = vmatpush3.bf16.msra.mxu1 %v440_v57 }
  0x29   :  { %412 = vmatprep.subr.bf16.mxu0 %v441_v58  ;;  %426 = vmatprep.subr.bf16.mxu1 %v441_v58 }
  0x2b   :  { %78 = vadd.xlane.f32.xlu0 %v77_v14  ;;  %413 = vmatpush3.bf16.msra.mxu0 %v441_v58 }
  0x2c   :  { %81 = vadd.xlane.f32.xlu1 %v80_v15  ;;  %430 = vmatpush3.bf16.msra.mxu1 %v441_v58 }
  0x2d   :  { %414 = vmatprep.subr.bf16.mxu0 %v442_v59  ;;  %427 = vmatprep.subr.bf16.mxu1 %v442_v59 }
  0x2f   :  { %415 = vmatpush3.bf16.msra.mxu0 %v442_v59 }
  0x30   :  { %431 = vmatpush3.bf16.msra.mxu1 %v442_v59 }
  0xa8   :  { %v61_v16 = vpop.xlane.xlu0 %60 }
  0xa9   :  { %v73_v17 = vpop.xlane.xlu1 %72  ;;  %v84_v18 = vmul.f32 0.015625, %v61_v16 }
  0xaa   :  { %v88_v19 = vmul.f32 0.015625, %v73_v17 }
  0xab   :  { %v579_v20 = vsub.f32 %v50_v0, %v84_v18 }
  0xac   :  { %v581_v21 = vsub.f32 %v54_v1, %v88_v19  ;;  %v64_v22 = vpop.xlane.xlu0 %63 }
  0xad   :  { %v76_v23 = vpop.xlane.xlu1 %75  ;;  %v85_v24 = vmul.f32 0.015625, %v64_v22  ;;  %v100_v26 = vmul.f32 %v579_v20, %v579_v20 }
  0xae   :  { %v89_v25 = vmul.f32 0.015625, %v76_v23  ;;  %v104_v27 = vmul.f32 %v581_v21, %v581_v21 }
  0xaf   :  { %v587_v28 = vsub.f32 %v51_v2, %v85_v24  ;;  %v108_v30 = vsel %vm58_vm0, %v100_v26, 0.0  ;;  %v373_v24 = vld [vmem:[%s655_s1] ss:$0 sm:$0xff] }
  0xb0   :  { %v589_v29 = vsub.f32 %v55_v5, %v89_v25  ;;  %109 = vadd.xlane.f32.xlu0 %v108_v30  ;;  %v67_v31 = vpop.xlane.xlu0 %66  ;;  %v120_v33 = vsel %vm58_vm0, %v104_v27, 0.0 }
  0xb1   :  { %v70_v32 = vpop.xlane.xlu1 %69  ;;  %v86_v34 = vmul.f32 0.015625, %v67_v31  ;;  %v101_v36 = vmul.f32 %v587_v28, %v587_v28  ;;  %v374_v31 = vld [vmem:[%s656_s2] ss:$0 sm:$0xff] }
  0xb2   :  { %v87_v35 = vmul.f32 0.015625, %v70_v32  ;;  %v105_v37 = vmul.f32 %v589_v29, %v589_v29 }
  0xb3   :  { %v597_v38 = vsub.f32 %v52_v7, %v86_v34  ;;  %v111_v40 = vsel %vm58_vm0, %v101_v36, 0.0 }
  0xb4   :  { %v599_v39 = vsub.f32 %v53_v9, %v87_v35  ;;  %121 = vadd.xlane.f32.xlu0 %v120_v33  ;;  %112 = vadd.xlane.f32.xlu1 %v111_v40  ;;  %v79_v41 = vpop.xlane.xlu0 %78  ;;  %v123_v43 = vsel %vm58_vm0, %v105_v37, 0.0 }
  0xb5   :  { %v82_v42 = vpop.xlane.xlu1 %81  ;;  %v90_v44 = vmul.f32 0.015625, %v79_v41  ;;  %v102_v46 = vmul.f32 %v597_v38, %v597_v38 }
  0xb6   :  { %v91_v45 = vmul.f32 0.015625, %v82_v42  ;;  %v103_v47 = vmul.f32 %v599_v39, %v599_v39 }
  0xb7   :  { %v607_v48 = vsub.f32 %v56_v12, %v90_v44  ;;  %v114_v50 = vsel %vm58_vm0, %v102_v46, 0.0 }
  0xb8   :  { %v609_v49 = vsub.f32 %v57_v13, %v91_v45  ;;  %124 = vadd.xlane.f32.xlu1 %v123_v43  ;;  %115 = vadd.xlane.f32.xlu0 %v114_v50  ;;  %v117_v51 = vsel %vm58_vm0, %v103_v47, 0.0 }
  0xb9   :  { %v106_v52 = vmul.f32 %v607_v48, %v607_v48 }
  0xba   :  { %v107_v53 = vmul.f32 %v609_v49, %v609_v49 }
  0xbb   :  { %v126_v54 = vsel %vm58_vm0, %v106_v52, 0.0 }
  0xbc   :  { %118 = vadd.xlane.f32.xlu1 %v117_v51  ;;  %127 = vadd.xlane.f32.xlu0 %v126_v54  ;;  %v129_v55 = vsel %vm58_vm0, %v107_v53, 0.0 }
  0xc0   :  { %130 = vadd.xlane.f32.xlu1 %v129_v55 }
 0x139   :  { %v110_v60 = vpop.xlane.xlu0 %109 }
 0x13a   :  { %v132_v61 = vmul.f32 0.015625, %v110_v60 }
 0x13c   :  { %v140_v62 = vadd.f32 1e-05, %v132_v61 }
 0x13d   :  { %v113_v63 = vpop.xlane.xlu1 %112  ;;  %v122_v0 = vpop.xlane.xlu0 %121 }
 0x13e   :  { %443 = vrsqrt.f32 %v140_v62  ;;  %v133_v1 = vmul.f32 0.015625, %v113_v63  ;;  %v136_v2 = vmul.f32 0.015625, %v122_v0 }
 0x140   :  { %v141_v3 = vadd.f32 1e-05, %v133_v1  ;;  %v144_v4 = vadd.f32 1e-05, %v136_v2 }
 0x141   :  { %v125_v5 = vpop.xlane.xlu1 %124  ;;  %v116_v6 = vpop.xlane.xlu0 %115 }
 0x142   :  { %445 = vrsqrt.f32 %v141_v3  ;;  %v137_v7 = vmul.f32 0.015625, %v125_v5  ;;  %v134_v8 = vmul.f32 0.015625, %v116_v6 }
 0x143   :  { %447 = vrsqrt.f32 %v144_v4 }
 0x144   :  { %v145_v9 = vadd.f32 1e-05, %v137_v7  ;;  %v142_v10 = vadd.f32 1e-05, %v134_v8 }
 0x145   :  { %v119_v11 = vpop.xlane.xlu1 %118  ;;  %v128_v12 = vpop.xlane.xlu0 %127 }
 0x146   :  { %449 = vrsqrt.f32 %v145_v9  ;;  %v135_v13 = vmul.f32 0.015625, %v119_v11  ;;  %v138_v14 = vmul.f32 0.015625, %v128_v12 }
 0x147   :  { %451 = vrsqrt.f32 %v142_v10 }
 0x148   :  { %v143_v15 = vadd.f32 1e-05, %v135_v13  ;;  %v146_v16 = vadd.f32 1e-05, %v138_v14 }
 0x149   :  { %v131_v17 = vpop.xlane.xlu1 %130 }
 0x14a   :  { %453 = vrsqrt.f32 %v143_v15  ;;  %v139_v18 = vmul.f32 0.015625, %v131_v17 }
 0x14b   :  { %v444_v19 = vpop.eup %443  ;;  %455 = vrsqrt.f32 %v146_v16 }
 0x14c   :  { %v147_v22 = vadd.f32 1e-05, %v139_v18  ;;  %v156_v23 = vmul.f32 %v444_v19, %v579_v20 }
 0x14e   :  { %457 = vrsqrt.f32 %v147_v22  ;;  %v171_v30 = vmul.f32 %v373_v24, %v156_v23 }
 0x14f   :  { %v446_v25 = vpop.eup %445 }
 0x150   :  { %v448_v26 = vpop.eup %447  ;;  %v157_v27 = vmul.f32 %v446_v25, %v587_v28  ;;  %v186_v20 = vadd.f32 %v374_v31, %v171_v30 }
 0x151   :  { %v160_v32 = vmul.f32 %v448_v26, %v581_v21 }
 0x152   :  { %v172_v33 = vmul.f32 %v373_v24, %v157_v27 }
 0x153   :  { %v450_v34 = vpop.eup %449  ;;  %v175_v40 = vmul.f32 %v373_v24, %v160_v32 }
 0x154   :  { %v452_v35 = vpop.eup %451  ;;  %v187_v36 = vadd.f32 %v374_v31, %v172_v33  ;;  %v161_v37 = vmul.f32 %v450_v34, %v589_v29 }
 0x155   :  { %v158_v41 = vmul.f32 %v452_v35, %v597_v38  ;;  %v190_v45 = vadd.f32 %v374_v31, %v175_v40 }
 0x156   :  { %v194_v42 = vpack.c.bf16 %v187_v36, %v186_v20  ;;  %v176_v43 = vmul.f32 %v373_v24, %v161_v37 }
 0x157   :  { %v454_v28 = vpop.eup %453  ;;  %v173_v47 = vmul.f32 %v373_v24, %v158_v41 }
 0x158   :  { %v456_v44 = vpop.eup %455  ;;  %416 = vmatprep.mubr.msk.bf16.mxu0 %vm58_vm0, %v194_v42  ;;  %v191_v46 = vadd.f32 %v374_v31, %v176_v43  ;;  %v159_v21 = vmul.f32 %v454_v28, %v599_v39 }
 0x159   :  { %v162_v50 = vmul.f32 %v456_v44, %v607_v48  ;;  %v188_v29 = vadd.f32 %v374_v31, %v173_v47  ;;  %v375_v48 = vld [vmem:[%s658_s4] ss:$0 sm:$0xff]  ;;  %s531_s4 = smov [#allocation7]  }
 0x15a   :  { %v196_v51 = vpack.c.bf16 %v191_v46, %v190_v45  ;;  %v174_v52 = vmul.f32 %v373_v24, %v159_v21  ;;  %s360_s9 = sshll.u32 %s531_s4, 4  ;;  %s361_s9 = int_to_ptr.vmem [resolvable:$true] %s360_s9 }
 0x15b   :  { %v458_v53 = vpop.eup %457  ;;  %v177_v55 = vmul.f32 %v373_v24, %v162_v50  ;;  %s499_s10 = scalar_lea.vmem %s361_s9, 512  ;;  %p504_p11 = scmp.lt.s32.totalorder %s361_s9, %s361_s9 }
 0x15c   :  { %420 = vmatprep.mubr.msk.bf16.mxu1 %vm58_vm0, %v196_v51  ;;  %v189_v38 = vadd.f32 %v374_v31, %v174_v52  ;;  %v163_v54 = vmul.f32 %v458_v53, %v609_v49  ;;  %p500_p10 = scmp.ne.s32.totalorder %s361_s9, %s499_s10  ;;  %p505_p12 = scmp.lt.s32.totalorder %s499_s10, %s499_s10 }
 0x15d   :  { %v192_v58 = vadd.f32 %v374_v31, %v177_v55 }
 0x15e   :  { %v195_v56 = vpack.c.bf16 %v189_v38, %v188_v29  ;;  %v178_v57 = vmul.f32 %v373_v24, %v163_v54  ;;  %p506_p13 = por %p505_p12, %p504_p11 }
 0x160   :  { %417 = vmatmul.mubr.msk.bf16.vlgmr.msra.gmra.mxu0 %vm58_vm0, %v195_v56  ;;  %v193_v59 = vadd.f32 %v374_v31, %v178_v57  ;;  %p507_p0 = pnand %p506_p13, %p500_p10 }
 0x162   :  { %v197_v39 = vpack.c.bf16 %v193_v59, %v192_v58 }
 0x164   :  { %421 = vmatmul.mubr.msk.bf16.vlgmr.msra.gmra.mxu1 %vm58_vm0, %v197_v39 }
 0x220   :  { %v418_v60 = vpop.f32.mrf.mxu0 }
 0x221   :  { %v292_v61 = vadd.f32 %v418_v60, %v375_v48 }
 0x222   :  { %v283_v62 = vpop.f32.mrf.mxu0 }
 0x223   :  { %v394_v63 = vpack.c.bf16 %v292_v61, %v292_v61  ;;  %v284_v49 = vadd.f32 %v375_v48, %v283_v62 }
 0x224   :  { %v419_v0 = vpop.f32.mrf.mxu0  ;;  %v422_v1 = vpop.f32.mrf.mxu1 }
 0x225   :  { %349 = vst.msk [vmem:[#allocation7 + $0x8] sm:$0xf] %vm346_vm1, %v394_v63  ;;  %v392_v2 = vpack.c.bf16 %v284_v49, %v284_v49  ;;  %v295_v3 = vadd.f32 %v419_v0, %v375_v48  ;;  %v308_v4 = vadd.f32 %v422_v1, %v375_v48 }
 0x226   :  { %v286_v5 = vpop.f32.mrf.mxu0  ;;  %v299_v6 = vpop.f32.mrf.mxu1 }
 0x227   :  { %347 = vst.msk [vmem:[#allocation7] sm:$0xf] %vm346_vm1, %v392_v2  ;;  %v395_v7 = vpack.c.bf16 %v295_v3, %v295_v3  ;;  %v398_v8 = vpack.c.bf16 %v308_v4, %v308_v4  ;;  %v287_v9 = vadd.f32 %v375_v48, %v286_v5  ;;  %v300_v10 = vadd.f32 %v375_v48, %v299_v6 }
 0x228   :  { %v423_v11 = vpop.f32.mrf.mxu1 }
 0x229   :  { %350 = vst.msk [vmem:[#allocation7 + $0xc] sm:$0xf] %vm346_vm1, %v395_v7  ;;  %353 = vst.msk [vmem:[#allocation7 + $0x18] sm:$0xf] %vm346_vm1, %v398_v8  ;;  %v393_v12 = vpack.c.bf16 %v287_v9, %v287_v9  ;;  %v396_v13 = vpack.c.bf16 %v300_v10, %v300_v10  ;;  %v311_v14 = vadd.f32 %v423_v11, %v375_v48 }
 0x22a   :  { %v302_v15 = vpop.f32.mrf.mxu1 }
 0x22b   :  { %348 = vst.msk [vmem:[#allocation7 + $0x4] sm:$0xf] %vm346_vm1, %v393_v12  ;;  %351 = vst.msk [vmem:[#allocation7 + $0x10] sm:$0xf] %vm346_vm1, %v396_v13  ;;  %v399_v16 = vpack.c.bf16 %v311_v14, %v311_v14  ;;  %v303_v17 = vadd.f32 %v375_v48, %v302_v15 }
 0x22d   :  { %354 = vst.msk [vmem:[#allocation7 + $0x1c] sm:$0xf] %vm346_vm1, %v399_v16  ;;  %v397_v18 = vpack.c.bf16 %v303_v17, %v303_v17 }
 0x22f   :  { %352 = vst.msk [vmem:[#allocation7 + $0x14] sm:$0xf] %vm346_vm1, %v397_v18 }
 0x230   :  { %510 = shalt.err (!%p507_p0)
}
 0x231   :  { %366 = dma.vmem_to_hbm [thread:$0]  %s361_s9, 512, %s659_s5, [#allocation4], %s529_s28, %s529_s28, %s530_s29  }
 0x232   :  { %523 = dma.done.wait [#allocation4], 512  }
 0x233   :  { %524 = vsyncadd [#allocation4], 4294966784 }
 0x234   :  { %370 = vsyncpa [#allocation3], 1 }
 0x235   :  { %371 = vsyncpa [#allocation6], 1 }
 0x236   :  { %372 = vsyncpa [#allocation4], 1 }

</bundles_post_ra>
